<compile_context>
chip_gen: v7x
topology: tpu7x:2x2x1
jax: 0.10.0
libtpu: 0.0.40
codegen_flags: <defaults>
</compile_context>

<pallas_src>
import jax
import jax.numpy as jnp
from jax.experimental import pallas as pl
from jax.experimental.pallas import tpu as pltpu


# -----------------------------------------------------------------------------
# Buffer construction (deterministic setup, plain JAX -- not the hot path)
# -----------------------------------------------------------------------------
def make_pe_2d(d_model: int, height: int, width: int, dtype=jnp.float32):
    """PositionalEncoding2D buffer, shape (1, d_model, H, W):
       pe[i]   = sin(y / 10000**(2*i/d_model))   (even channels, depends on y)
       pe[i+1] = cos(x / 10000**(2*i/d_model))   (odd channels,  depends on x)"""
    i = jnp.arange(0, d_model, 2, dtype=jnp.float32)                  # even channel index
    denom = jnp.power(10000.0, 2.0 * i / d_model)[:, None, None]      # (d/2, 1, 1)
    ys = jnp.arange(height, dtype=jnp.float32)[None, :, None]
    xs = jnp.arange(width, dtype=jnp.float32)[None, None, :]
    even = jnp.broadcast_to(jnp.sin(ys / denom), (d_model // 2, height, width))
    odd = jnp.broadcast_to(jnp.cos(xs / denom), (d_model // 2, height, width))
    pe = jnp.stack([even, odd], axis=1).reshape(d_model, height, width)
    return pe[None].astype(dtype)


# -----------------------------------------------------------------------------
# Pallas kernel (pure broadcast-add; memory-bound elementwise)
# -----------------------------------------------------------------------------
def _pe_add_kernel(x_ref, pe_ref, o_ref):
    # x/o block: (TR, TL); pe block: (1, TL) (sublane-broadcast) or (TR, TL).
    o_ref[...] = x_ref[...] + pe_ref[...]


def _choose_blocks(rows: int, lanes: int, itemsize: int,
                   target_bytes: int = 4 << 20,        # ~4 MiB blocks (v7x/v6e sweet spot)
                   single_block_bytes: int = 512 << 10):
    """Pick (row_tile, lane_tile).

    * tiny arrays (<=512 KiB, rows<16): single block -- launch-overhead bound anyway.
    * lane tile: multiple of 128 that divides `lanes`, capped so an 8-row stripe
      stays within the target (large C*H*W cannot blow VMEM).
    * row tile: multiple of 8 (or the full row count when rows<16), ~target bytes,
      and capped so rows>=16 always yields >=2 row blocks (v7x megacore).
    Double-buffered in+out at 4 MiB blocks is ~16 MiB; we raise the scoped VMEM
    limit to 32 MiB below, which is valid on v5e/v6e/v7x.
    """
    total = rows * lanes * itemsize
    if total <= single_block_bytes and rows < 16:
        return rows, lanes
    # lane tile
    max_tl = max(128, (target_bytes // (8 * itemsize)) // 128 * 128)
    if lanes <= max_tl:
        tl = lanes
    else:
        k = max_tl // 128
        while lanes % (k * 128) != 0:      # 128 always divides `lanes` (padded)
            k -= 1
        tl = k * 128
    # row tile
    if rows < 16:
        tr = rows                           # full extent (allowed even if not %8)
    else:
        budget_rows = max(8, (target_bytes // (tl * itemsize)) // 8 * 8)
        tr = min(budget_rows, rows // 8 * 8)
        tr = min(tr, max(8, (rows // 2) // 8 * 8))   # >=2 row blocks -> both TCs on v7x
        tr = max(tr, 8)
    return tr, tl


def _pe_add(x2, pe2):
    """x2: (rows, lanes) lane-dense (lanes % 128 == 0).
    pe2: (1, lanes)  -> broadcast over all rows, or
         (P, lanes)  -> repeats with period P along rows (P % 8 == 0, P | rows)."""
    rows, lanes = x2.shape
    pe_rows = pe2.shape[0]
    assert lanes % 128 == 0, "lane axis must be padded to a multiple of 128"
    assert pe2.shape[1] == lanes

    itemsize = jnp.dtype(x2.dtype).itemsize
    if pe_rows == 1:
        tr, tl = _choose_blocks(rows, lanes, itemsize)
    else:
        assert rows % pe_rows == 0 and (pe_rows % 8 == 0 or pe_rows == rows)
        tr, tl = pe_rows, lanes            # one pe period per block

    grid = (pl.cdiv(rows, tr), pl.cdiv(lanes, tl))
    return pl.pallas_call(
        _pe_add_kernel,
        out_shape=jax.ShapeDtypeStruct((rows, lanes), x2.dtype),
        grid=grid,
        in_specs=[
            pl.BlockSpec((tr, tl), lambda r, l: (r, l)),        # x tile
            pl.BlockSpec((pe_rows, tl), lambda r, l: (0, l)),   # pe: constant row block
        ],
        out_specs=pl.BlockSpec((tr, tl), lambda r, l: (r, l)),  # lane-dense full-width stores
        compiler_params=pltpu.CompilerParams(
            dimension_semantics=("parallel", "parallel"),        # no reduction axes
            vmem_limit_bytes=32 * 1024 * 1024,                   # fits 2x(in+out) 4 MiB blocks
        ),
    )(x2, pe2)


def _padded_pe_add(x2, pe2, lanes):
    """Pad the lane axis to a multiple of 128, run the kernel, slice back."""
    pad = (-lanes) % 128
    if pad:
        x2 = jnp.pad(x2, ((0, 0), (0, pad)))
        pe2 = jnp.pad(pe2, ((0, 0), (0, pad)))
    out = _pe_add(x2, pe2)
    if pad:
        out = out[:, :lanes]
    return out


# -----------------------------------------------------------------------------
# Module wrapper: PositionalEncoding2D.forward
# -----------------------------------------------------------------------------
def positional_encoding_2d_forward(x, pe):
    """SimpleModel's PositionalEncoding2D.forward: out = x + pe.
    x: (N, d_model, H, W); pe: (1, d_model, H, W)."""
    N, C, H, W = x.shape
    assert pe.shape == (1, C, H, W)
    pe = pe.astype(x.dtype)

    if N < 8 and C >= 8 and C % 8 == 0:
        # Small batch: fold channels into the sublane axis so every block has
        # >= 8 useful sublanes (no 4x vreg/VPU waste at tiny N).  pe keeps its
        # per-channel rows and is broadcast over the batch by the index_map.
        lanes = H * W
        x2 = x.reshape(N * C, lanes)
        pe2 = pe.reshape(C, lanes)
        out = _padded_pe_add(x2, pe2, lanes)
        return out.reshape(N, C, H, W)

    # Batch >= 8: lane-dense flatten of (C, H, W); pe is a single resident row.
    lanes = C * H * W
    x2 = x.reshape(N, lanes)
    pe2 = pe.reshape(1, lanes)
    out = _padded_pe_add(x2, pe2, lanes)
    return out.reshape(N, C, H, W)


# -----------------------------------------------------------------------------
# Demo / self-check
# -----------------------------------------------------------------------------
if __name__ == "__main__":
    key = jax.random.PRNGKey(0)
    k1, k2, k3 = jax.random.split(key, 3)

    # SimpleModel fixes the board positional encoding to
    # PositionalEncoding2D(ff_size, 20, 10); use ff_size = 32.
    ff_size, Hh, Ww = 32, 20, 10
    pe = make_pe_2d(ff_size, Hh, Ww)

    # --- batch = 2: small-batch path (channels folded into the sublane axis) ---
    x_small = jax.random.normal(k1, (2, ff_size, Hh, Ww), dtype=jnp.float32)
    out_small = jax.block_until_ready(positional_encoding_2d_forward(x_small, pe))
    assert out_small.shape == x_small.shape
    assert jnp.allclose(out_small, x_small + pe, atol=1e-6), "2D PE mismatch (N=2)"

    # --- batch = 8: lane-dense single-block path ---
    x_mid = jax.random.normal(k2, (8, ff_size, Hh, Ww), dtype=jnp.float32)
    out_mid = jax.block_until_ready(positional_encoding_2d_forward(x_mid, pe))
    assert jnp.allclose(out_mid, x_mid + pe, atol=1e-6), "2D PE mismatch (N=8)"

    # --- batch = 32: tiled path with >= 2 row blocks (megacore on v7x) ---
    x_big = jax.random.normal(k3, (32, ff_size, Hh, Ww), dtype=jnp.float32)
    out_big = jax.block_until_ready(positional_encoding_2d_forward(x_big, pe))
    assert jnp.allclose(out_big, x_big + pe, atol=1e-6), "2D PE mismatch (N=32)"

    print("KERNEL_OK")
</pallas_src>

<mosaic_0001>
module attributes {stable_mosaic.version = 11 : i64} {
  func.func @_pe_add_kernel(%arg0: i32, %arg1: i32, %arg2: memref<32x256xf32, #tpu.memory_space<vmem>>, %arg3: memref<32x256xf32, #tpu.memory_space<vmem>>, %arg4: memref<32x256xf32, #tpu.memory_space<vmem>>) attributes {dimension_semantics = [#tpu.dimension_semantics<parallel>, #tpu.dimension_semantics<parallel>], iteration_bounds = array<i64: 2, 1>, scalar_prefetch = 0 : i64, scratch_operands = 0 : i64, tpu.core_type = #tpu.core_type<tc>, window_params = [{transform_indices = @transform_0, window_bounds = array<i64: 32, 256>}, {transform_indices = @transform_1, window_bounds = array<i64: 32, 256>}, {transform_indices = @transform_2, window_bounds = array<i64: 32, 256>}]} {
    %c0 = arith.constant 0 : index
    %c0_0 = arith.constant 0 : index
    %0 = vector.load %arg2[%c0, %c0_0] : memref<32x256xf32, #tpu.memory_space<vmem>>, vector<32x256xf32>
    %c0_1 = arith.constant 0 : index
    %c0_2 = arith.constant 0 : index
    %1 = vector.load %arg3[%c0_1, %c0_2] : memref<32x256xf32, #tpu.memory_space<vmem>>, vector<32x256xf32>
    %2 = arith.addf %0, %1 : vector<32x256xf32>
    %c0_3 = arith.constant 0 : index
    %c0_4 = arith.constant 0 : index
    %3 = vector.load %arg4[%c0_3, %c0_4] : memref<32x256xf32, #tpu.memory_space<vmem>>, vector<32x256xf32>
    tpu.vector_store %arg4[%c0_3, %c0_4], %2 {strides = array<i32>} : memref<32x256xf32, #tpu.memory_space<vmem>>, vector<32x256xf32>,
    return
  }
  func.func @transform_0(%arg0: i32, %arg1: i32) -> (i32, i32) {
    %c0_i32 = arith.constant 0 : i32
    return %arg0, %arg1 : i32, i32
  }
  func.func @transform_1(%arg0: i32, %arg1: i32) -> (i32, i32) {
    %c0_i32 = arith.constant 0 : i32
    %c0_i32_0 = arith.constant 0 : i32
    return %c0_i32, %arg1 : i32, i32
  }
  func.func @transform_2(%arg0: i32, %arg1: i32) -> (i32, i32) {
    %c0_i32 = arith.constant 0 : i32
    return %arg0, %arg1 : i32, i32
  }
}

</mosaic_0001>

<bundles_post_ra>
// kernel: tpu_custom_call.1
= control target key start
LH: loop header
LB: loop body
LE: loop exit
PB: predicated region body
PF: predicated region fallthrough
CT: control target
= control target key end

     0   :  { %7 = vsyncpa [#allocation3], 0  ;;  %s860_s0 = inlined_call_operand.hbm [shape: f32[64,256], index: 0, kind: input, shape index: {}]   ;;  %s861_s1 = inlined_call_operand.hbm [shape: f32[32,256], index: 1, kind: input, shape index: {}]   ;;  %s862_s2 = inlined_call_operand.hbm [shape: f32[64,256], index: 2, kind: output, shape index: {}]  }
   0x1   :  { %9 = vsyncpa [#allocation3 + $0x1], 0 }
   0x2   :  { %10 = vsyncpa [#allocation6], 0 }
   0x3   :  { %11 = vsyncpa [#allocation4], 0 }
   0x4   :  { %13 = vsyncpa [#allocation4 + $0x1], 0  ;;  %s625_s9 = smov 0   ;;  %s627_s10 = smov 0  }
   0x5   :  { %s629_s11 = smov 0   ;;  %s631_s12 = smov 0  }
   0x6   :  { %s633_s13 = smov 0   ;;  %s635_s14 = smov 0  }
   0x7 LB: > { %s357_s15 = sadd.s32 4294967295, %s601_s14   ;;  %s358_s16 = sadd.s32 4294967294, %s601_s14   ;;  %s601_s14 = sphi %s635_s14, %s19_s14   ;;  %s597_s13 = sphi %s633_s13, %s886_s13   ;;  %s593_s12 = sphi %s631_s12, %s885_s12   ;;  %s589_s11 = sphi %s629_s11, %s884_s11   ;;  %s585_s10 = sphi %s627_s10, %s883_s10   ;;  %s581_s9 = sphi %s625_s9, %s882_s9  }
   0x8   : > { %p53_p0 = scmp.ne.s32.totalorder %s585_s10, %s581_s9  ;;  %p659_p1 = scmp.eq.s32.totalorder %s357_s15, 0 }
   0x9   : > { %p663_p2 = scmp.eq.s32.totalorder %s357_s15, 1  ;;  %p111_p3 = scmp.eq.s32.totalorder %s358_s16, 1 }
   0xa   : > { %s867_s17 = scalar_select %p659_p1, 1, 0 }
   0xb   : > { %s868_s18 = scalar_select %p663_p2, 1, 0 }
   0xc   : > { %p669_p4 = por %p659_p1, %p53_p0  ;;  %p359_p5 = scmp.ge.s32.totalorder %s601_s14, 1 }
   0xd   : > { %p674_p6 = por %p111_p3, %p53_p0  ;;  %p118_p7 = scmp.lt.s32.totalorder %s601_s14, 3 }
   0xe   : > { %s869_s19 = scalar_select %p669_p4, 1, 0 }
   0xf   : > { %s870_s20 = scalar_select %p674_p6, 1, 0 }
  0x10   : > { %p679_p8 = pnand %p359_p5, %p118_p7  ;;  %s603_s22 = smov [#allocation5]  }
  0x11   : > { %s133_s23 = sshll.u32 %s603_s22, 4  ;;  %s31_s25 = sadd.s32 1, %s597_s13  ;;  %s134_s23 = int_to_ptr.vmem [resolvable:$true] %s133_s23 }
  0x12   : > { %s871_s21 = scalar_select %p679_p8, 1, 0 }
  0x13   : > { %p388_p9 = pneg %p679_p8  ;;  %s457_s28 = scalar_lea.hbm %s861_s1, 1024 }
  0x14   : > { %p458_p12 = scmp.ne.s32.totalorder %s861_s1, %s457_s28  ;;  %p464_p5 = scmp.lt.u32.totalorder %s457_s28, %s861_s1 }
  0x15   : > { %p688_p11 = pnand %p388_p9, %p659_p1 }
  0x17   : > { %p459_p13 = pneg %p688_p11 }
  0x19   : > { %p460_p0 = pnand %p459_p13, %p458_p12 }
  0x1b   : > { %p461_p3 = pneg %p460_p0 }
  0x1d   : > { %p466_p7 = pnand %p464_p5, %p461_p3 }
  0x1f   : > { %469 = shalt.err (!%p466_p7)
}
  0x20   : > { %s470_s5 = scalar_lea.vmem %s134_s23, 1024  ;;  %p478_p1 = scmp.lt.s32.totalorder %s134_s23, %s134_s23 }
  0x21   : > { %p471_p9 = scmp.ne.s32.totalorder %s134_s23, %s470_s5  ;;  %p479_p4 = scmp.lt.s32.totalorder %s470_s5, %s470_s5 }
  0x23   : > { %p473_p10 = pnand %p471_p9, %p459_p13  ;;  %p480_p8 = por %p479_p4, %p478_p1 }
  0x25   : > { %p474_p6 = pneg %p473_p10 }
  0x27   : > { %p481_p2 = pnand %p480_p8, %p474_p6 }
  0x29   : > { %484 = shalt.err (!%p481_p2)
}
  0x2a   : > { %s604_s6 = smov 256   ;;  %s605_s7 = smov 16  }
  0x2b   : > { %391 = dma.hbm_to_vmem [thread:$0]  (!%p688_p11), %s861_s1, 1024, %s134_s23, [#allocation6], %s604_s6, %s604_s6, %s605_s7  }
  0x2c   : > { %p33_p1 = scmp.ge.s32.totalorder %s31_s25, 2  ;;  %s40_s16 = sadd.s32 1, %s589_s11 }
  0x2d   : > { %p47_p2 = scmp.ne.s32.totalorder %s589_s11, %s585_s10  ;;  %p48_p4 = scmp.eq.s32.totalorder %s601_s14, 0 }
  0x2e   : > { %s888_s25 = smov (%p33_p1, %s31_s25), 0  ;;  %p874_p8 = scmp.ne.s32.totalorder %s868_s18, 0 }
  0x2f   : > { %p718_p6 = por %p48_p4, %p47_p2  ;;  %s35_s26 = ssub.s32 %s597_s13, %s888_s25 }
  0x30   : > { %p724_p10 = por %p874_p8, %p47_p2  ;;  %p401_p12 = scmp.lt.s32.totalorder %s601_s14, 2 }
  0x31   : > { %p38_p11 = scmp.eq.s32.totalorder %s35_s26, 0  ;;  %s147_s23 = sand.u32 1, %s589_s11  }
  0x32   : > { %s362_s27 = sshll.u32 %s147_s23, 6  ;;  %s377_s29 = sshll.u32 %s597_s13, 10 }
  0x33   : > { %s733_s28 = scalar_select %p38_p11, %s589_s11, %s40_s16  }
  0x34   : > { %s739_s4 = scalar_lea.hbm %s860_s0, %s377_s29  ;;  %s151_s18 = scalar_lea.vmem [#allocation2], %s362_s27 }
  0x35   : > { %s161_s5 = sshll.u32 %s151_s18, 4  ;;  %p745_p13 = pnand %p401_p12, %p718_p6  ;;  %s741_s5 = int_to_ptr.vmem [resolvable:$true] %s161_s5 }
  0x36   : > { %s749_s15 = scalar_lea.sflag [#allocation3], %s147_s23  ;;  %s485_s16 = scalar_lea.hbm %s739_s4, 1024 }
  0x37   : > { %p486_p0 = scmp.ne.s32.totalorder %s739_s4, %s485_s16  ;;  %p487_p3 = pneg %p745_p13 }
  0x38   : > { %s490_s22 = scalar_lea.hbm %s860_s0, 2048  ;;  %p491_p9 = scmp.lt.u32.totalorder %s739_s4, %s860_s0 }
  0x39   : > { %p488_p5 = pnand %p487_p3, %p486_p0  ;;  %p492_p1 = scmp.lt.u32.totalorder %s490_s22, %s485_s16 }
  0x3a   : > { %p494_p4 = scmp.lt.u32.totalorder %s485_s16, %s739_s4 }
  0x3b   : > { %p489_p7 = pneg %p488_p5  ;;  %p493_p2 = por %p492_p1, %p491_p9 }
  0x3d   : > { %p495_p6 = por %p494_p4, %p493_p2 }
  0x3f   : > { %p496_p8 = pnand %p495_p6, %p489_p7 }
  0x41   : > { %499 = shalt.err (!%p496_p8)
}
  0x42   : > { %s500_s23 = scalar_lea.vmem %s741_s5, 1024  ;;  %s606_s3 = smov [#allocation2]  }
  0x43   : > { %p501_p12 = scmp.ne.s32.totalorder %s741_s5, %s500_s23  ;;  %s505_s18 = sshll.u32 %s606_s3, 4  ;;  %s506_s18 = int_to_ptr.vmem [resolvable:$false] %s505_s18 }
  0x44   : > { %s507_s26 = scalar_lea.vmem %s506_s18, 2048  ;;  %p508_p5 = scmp.lt.s32.totalorder %s741_s5, %s506_s18 }
  0x45   : > { %p503_p11 = pnand %p501_p12, %p487_p3  ;;  %p509_p9 = scmp.lt.s32.totalorder %s507_s26, %s500_s23 }
  0x47   : > { %p504_p0 = pneg %p503_p11  ;;  %p510_p1 = por %p509_p9, %p508_p5 }
  0x49   : > { %p511_p2 = pnand %p510_p1, %p504_p0 }
  0x4b   : > { %514 = shalt.err (!%p511_p2)
}
  0x4c   : > { %395 = dma.hbm_to_vmem [thread:$0]  (!%p745_p13), %s739_s4, 1024, %s741_s5, %s749_s15, %s604_s6, %s604_s6, %s605_s7  }
  0x4d   : > { %p877_p3 = scmp.ne.s32.totalorder %s871_s21, 0 }
  0x4e   : > { %s783_s16 = sand.u32 (!%p877_p3), 1, %s585_s10   ;;  %p878_p7 = scmp.ne.s32.totalorder (!%p877_p3), %s869_s19, 0 }
  0x4f   : > { %173 = sbr.rel (%p877_p3) target bundleno = 116 (0x74), region = 28  ;;  %s367_s27 = sshll.u32 (!%p877_p3), %s783_s16, 6 }
  0x50   : > { %s176_s22 = scalar_lea.sflag (!%p877_p3), [#allocation3], %s783_s16  ;;  %s787_s29 = scalar_lea.vmem (!%p877_p3), [#allocation2], %s367_s27 }
  0x56   : > { %568 = dma.done.wait (%p878_p7), %s176_s22, 1024  }
  0x57   : > { %570 = vsyncadd (%p878_p7), %s176_s22, 4294966272  ;;  %p879_p13 = scmp.ne.s32.totalorder %s867_s17, 0 }
  0x59   : > { %572 = dma.done.wait (%p879_p13), [#allocation6], 1024  }
  0x5a   : > { %574 = vsyncadd (%p879_p13), [#allocation6], 4294966272  ;;  %v209_v0 = vld [vmem:[%s787_s29] sm:$0xff]  ;;  %v210_v2 = vld [vmem:[%s787_s29 + $0x8] sm:$0xff]  ;;  %s203_s19 = scalar_lea.vmem [#allocation7], %s367_s27  ;;  %s379_s17 = sshll.u32 %s593_s12, 10 }
  0x5b   : > { %v217_v1 = vld [vmem:[#allocation5] sm:$0xff]  ;;  %v218_v4 = vld [vmem:[#allocation5 + $0x8] sm:$0xff]  ;;  %v211_v5 = vld [vmem:[%s787_s29 + $0x10] sm:$0xff]  ;;  %s258_s21 = sshll.u32 %s203_s19, 4  ;;  %s811_s7 = scalar_lea.hbm %s862_s2, %s379_s17  ;;  %s806_s21 = int_to_ptr.vmem [resolvable:$true] %s258_s21 }
  0x5c   : > { %v225_v3 = vadd.f32 %v217_v1, %v209_v0  ;;  %v219_v6 = vld [vmem:[#allocation5 + $0x10] sm:$0xff]  ;;  %v226_v7 = vadd.f32 %v218_v4, %v210_v2  ;;  %v212_v9 = vld [vmem:[%s787_s29 + $0x18] sm:$0xff]  ;;  %v213_v11 = vld [vmem:[%s787_s29 + $0x20] sm:$0xff]  ;;  %s242_s4 = scalar_lea.sflag [#allocation4], %s783_s16  ;;  %s515_s5 = scalar_lea.vmem %s806_s21, 1024 }
  0x5d   : > { %v227_v8 = vadd.f32 %v219_v6, %v211_v5  ;;  %v220_v10 = vld [vmem:[#allocation5 + $0x18] sm:$0xff]  ;;  %v221_v13 = vld [vmem:[#allocation5 + $0x20] sm:$0xff]  ;;  %v214_v14 = vld [vmem:[%s787_s29 + $0x28] sm:$0xff]  ;;  %p516_p4 = scmp.ne.s32.totalorder %s806_s21, %s515_s5  ;;  %s607_s8 = smov [#allocation7]  }
  0x5e   : > { %233 = vst [vmem:[%s203_s19] sm:$0xff] %v225_v3  ;;  %v228_v12 = vadd.f32 %v220_v10, %v212_v9  ;;  %v222_v15 = vld [vmem:[#allocation5 + $0x28] sm:$0xff]  ;;  %234 = vst [vmem:[%s203_s19 + $0x8] sm:$0xff] %v226_v7  ;;  %v229_v16 = vadd.f32 %v221_v13, %v213_v11  ;;  %v215_v18 = vld [vmem:[%s787_s29 + $0x30] sm:$0xff]  ;;  %s519_s15 = sshll.u32 %s607_s8, 4  ;;  %s520_s15 = int_to_ptr.vmem [resolvable:$false] %s519_s15 }
  0x5f   : > { %235 = vst [vmem:[%s203_s19 + $0x10] sm:$0xff] %v227_v8  ;;  %v230_v17 = vadd.f32 %v222_v15, %v214_v14  ;;  %v223_v19 = vld [vmem:[#allocation5 + $0x30] sm:$0xff]  ;;  %v216_v20 = vld [vmem:[%s787_s29 + $0x38] sm:$0xff]  ;;  %p517_p6 = pnand %p516_p4, %p724_p10  ;;  %s521_s30 = scalar_lea.vmem %s520_s15, 2048 }
  0x60   : > { %236 = vst [vmem:[%s203_s19 + $0x18] sm:$0xff] %v228_v12  ;;  %v231_v21 = vadd.f32 %v223_v19, %v215_v18  ;;  %v224_v22 = vld [vmem:[#allocation5 + $0x38] sm:$0xff]  ;;  %237 = vst [vmem:[%s203_s19 + $0x20] sm:$0xff] %v229_v16  ;;  %p522_p12 = scmp.lt.s32.totalorder %s806_s21, %s520_s15  ;;  %p523_p11 = scmp.lt.s32.totalorder %s521_s30, %s515_s5 }
  0x61   : > { %238 = vst [vmem:[%s203_s19 + $0x28] sm:$0xff] %v230_v17  ;;  %v232_v23 = vadd.f32 %v224_v22, %v216_v20  ;;  %p518_p8 = pneg %p517_p6 }
  0x62   : > { %239 = vst [vmem:[%s203_s19 + $0x30] sm:$0xff] %v231_v21  ;;  %p524_p0 = por %p523_p11, %p522_p12 }
  0x63   : > { %240 = vst [vmem:[%s203_s19 + $0x38] sm:$0xff] %v232_v23 }
  0x64   : > { %p525_p5 = pnand %p524_p0, %p518_p8 }
  0x66   : > { %528 = shalt.err (!%p525_p5)
}
  0x67   : > { %s529_s23 = scalar_lea.hbm %s811_s7, 1024  ;;  %s533_s26 = scalar_lea.hbm %s862_s2, 2048 }
  0x68   : > { %p530_p9 = scmp.ne.s32.totalorder %s811_s7, %s529_s23  ;;  %p534_p3 = scmp.lt.u32.totalorder %s811_s7, %s862_s2 }
  0x69   : > { %p535_p7 = scmp.lt.u32.totalorder %s533_s26, %s529_s23  ;;  %p537_p4 = scmp.lt.u32.totalorder %s529_s23, %s811_s7 }
  0x6a   : > { %p531_p1 = pnand %p530_p9, %p724_p10 }
  0x6b   : > { %p536_p13 = por %p535_p7, %p534_p3 }
  0x6c   : > { %p532_p2 = pneg %p531_p1 }
  0x6d   : > { %p538_p6 = por %p537_p4, %p536_p13 }
  0x6f   : > { %p539_p8 = pnand %p538_p6, %p532_p2 }
  0x71   : > { %542 = shalt.err (!%p539_p8)
}
  0x72   : > { %s608_s29 = smov 256   ;;  %s609_s19 = smov 16  }
  0x73   : > { %386 = dma.vmem_to_hbm [thread:$0]  (%p724_p10), %s806_s21, 1024, %s811_s7, %s242_s4, %s608_s29, %s608_s29, %s609_s19  }
  0x74 PF: > { %s273_s17 = sand.u32 1, %s581_s9   ;;  %p880_p12 = scmp.ne.s32.totalorder %s870_s20, 0 }
  0x75   : > { %p881_p11 = scmp.ge.s32.totalorder %s601_s14, 2  ;;  %s274_s12 = scalar_lea.sflag [#allocation4], %s273_s17 }
  0x77   : > { %p397_p0 = pnand %p881_p11, %p880_p12 }
  0x79   : > { %576 = dma.done.wait (!%p397_p0), %s274_s12, 1024  }
  0x7a   : > { %578 = vsyncadd (!%p397_p0), %s274_s12, 4294966272  ;;  %s19_s14 = sadd.s32 1, %s601_s14   ;;  %s882_s9 = smov %s585_s10 }
  0x7b   : > { %p16_p5 = scmp.ge.s32.totalorder %s19_s14, 4   ;;  %s883_s10 = smov %s589_s11 }
  0x7c   : > { %s884_s11 = smov %s733_s28  ;;  %s885_s12 = smov %s597_s13 }
  0x7d   : > { %s886_s13 = smov %s888_s25  ;;  %18 = sbr.rel (!%p16_p5) target bundleno = 7 (0x7), region = 78 }
  0x84   :  { %279 = vsyncpa [#allocation3], 1 }
  0x85   :  { %281 = vsyncpa [#allocation3 + $0x1], 1 }
  0x86   :  { %282 = vsyncpa [#allocation6], 1 }
  0x87   :  { %283 = vsyncpa [#allocation4], 1 }
  0x88   :  { %285 = vsyncpa [#allocation4 + $0x1], 1 }

</bundles_post_ra>
